<compile_context>
chip_gen: v6e
topology: v6e:2x2x1
jax: 0.10.0
libtpu: 0.0.40
codegen_flags: <defaults>
</compile_context>

<pallas_src>
import functools

import jax
import jax.numpy as jnp
from jax.experimental import pallas as pl
from jax.experimental.pallas import tpu as pltpu

BN_EPS = 1e-5


def dapp_mlp_kernel(x_ref,
                    w0_ref, b0_ref,
                    w1_ref, b1_ref,
                    w2_ref, b2_ref,
                    gamma_ref, beta_ref,
                    out_ref,
                    sum_ref, sq_ref,
                    *, n_valid, tile_n):
    p = pl.program_id(0)   # 0 = statistics pass, 1 = normalize/emit pass
    i = pl.program_id(1)   # batch-tile index

    # ---- 3x (Linear + ReLU): bf16 MXU operands, f32 accumulation, f32 elementwise ----
    def linear_relu(h, w_ref, b_ref):
        acc = jnp.dot(h.astype(jnp.bfloat16),
                      w_ref[...].astype(jnp.bfloat16),
                      preferred_element_type=jnp.float32)
        return jnp.maximum(acc + b_ref[...], 0.0)

    h = linear_relu(x_ref[...], w0_ref, b0_ref)
    h = linear_relu(h, w1_ref, b1_ref)
    h = linear_relu(h, w2_ref, b2_ref)          # (tile_n, out_feats) f32

    # ---------------- pass 0: accumulate BN batch statistics ----------------
    @pl.when(jnp.logical_and(p == 0, i == 0))
    def _():
        sum_ref[...] = jnp.zeros_like(sum_ref)
        sq_ref[...] = jnp.zeros_like(sq_ref)

    @pl.when(p == 0)
    def _():
        hs = h
        if n_valid % tile_n != 0:   # static: mask zero-padded tail rows out of stats
            row = i * tile_n + jax.lax.broadcasted_iota(jnp.int32, (tile_n, 1), 0)
            hs = jnp.where(row < n_valid, h, 0.0)
        sum_ref[...] += jnp.sum(hs, axis=0, keepdims=True)
        sq_ref[...] += jnp.sum(hs * hs, axis=0, keepdims=True)

    # -------- pass 1: fold BN affine once, then apply (one mul + one add) --------
    @pl.when(jnp.logical_and(p == 1, i == 0))
    def _():
        inv_n = 1.0 / n_valid
        mean = sum_ref[...] * inv_n
        var = jnp.maximum(sq_ref[...] * inv_n - mean * mean, 0.0)  # biased var, clamped
        inv_std = jax.lax.rsqrt(var + BN_EPS)
        scale = gamma_ref[...] * inv_std
        sum_ref[...] = scale                        # scratch now holds scale
        sq_ref[...] = beta_ref[...] - mean * scale  # scratch now holds shift

    @pl.when(p == 1)
    def _():
        # Dropout(p=0.0) is identity.
        out_ref[...] = (h * sum_ref[...] + sq_ref[...]).astype(out_ref.dtype)


def dapp_mlp_forward(x, params, *, tile_n=1024):
    """x: (N, in_feats) float32.  params: see init_params. Returns (N, out_feats) f32."""
    n, in_feats = x.shape
    out_feats = params["w0"].shape[1]

    # Tile the batch: multiple of 8 (sublane), no larger than the (rounded) batch.
    tile_n = int(min(tile_n, ((n + 7) // 8) * 8))
    tile_n = max(8, (tile_n // 8) * 8)
    num_tiles = pl.cdiv(n, tile_n)
    n_pad = num_tiles * tile_n
    if n_pad != n:
        x = jnp.pad(x, ((0, n_pad - n), (0, 0)))

    operands = (
        x,
        params["w0"], params["b0"].reshape(1, -1),
        params["w1"], params["b1"].reshape(1, -1),
        params["w2"], params["b2"].reshape(1, -1),
        params["gamma"].reshape(1, -1), params["beta"].reshape(1, -1),
    )

    in_specs = [pl.BlockSpec((tile_n, in_feats), lambda p, i: (i, 0))]
    for op in operands[1:]:
        # Resident parameters: constant block index -> DMA'd once, kept in VMEM.
        in_specs.append(pl.BlockSpec(op.shape, lambda p, i: (0, 0)))

    kernel = functools.partial(dapp_mlp_kernel, n_valid=n, tile_n=tile_n)

    out = pl.pallas_call(
        kernel,
        out_shape=jax.ShapeDtypeStruct((n_pad, out_feats), jnp.float32),
        grid=(2, num_tiles),
        in_specs=in_specs,
        # Pass 0 pins the output index to block 0 (no write-backs during the stats pass);
        # pass 1 walks the tiles, so each output block is written exactly once.
        out_specs=pl.BlockSpec((tile_n, out_feats), lambda p, i: (i * p, 0)),
        scratch_shapes=[
            pltpu.VMEM((1, out_feats), jnp.float32),   # sum  -> later: scale
            pltpu.VMEM((1, out_feats), jnp.float32),   # sumsq -> later: shift
        ],
        compiler_params=pltpu.CompilerParams(
            dimension_semantics=("arbitrary", "arbitrary"),
            vmem_limit_bytes=32 * 1024 * 1024,
        ),
    )(*operands)

    return out[:n]


def init_params(key, in_feats, out_feats=64, layer_nums=3):
    """Deterministic init mimicking nn.Linear default (uniform +/- 1/sqrt(fan_in)).
    Weights stored pre-transposed as (in_features, out_features)."""
    assert layer_nums == 3
    params = {}
    fan_ins = [in_feats, out_feats, out_feats]
    for li, fan_in in enumerate(fan_ins):
        key, kw, kb = jax.random.split(key, 3)
        bound = 1.0 / jnp.sqrt(jnp.float32(fan_in))
        params[f"w{li}"] = jax.random.uniform(
            kw, (fan_in, out_feats), jnp.float32, -bound, bound)
        params[f"b{li}"] = jax.random.uniform(
            kb, (out_feats,), jnp.float32, -bound, bound)
    # BatchNorm1d affine defaults: weight=1, bias=0
    params["gamma"] = jnp.ones((out_feats,), jnp.float32)
    params["beta"] = jnp.zeros((out_feats,), jnp.float32)
    return params


def reference_forward(x, params):
    """Pure-JAX reference using the same bf16-matmul / f32-accumulate recipe."""
    h = x
    for li in range(3):
        w = params[f"w{li}"]
        hm = jnp.dot(h.astype(jnp.bfloat16), w.astype(jnp.bfloat16),
                     preferred_element_type=jnp.float32)
        h = jnp.maximum(hm + params[f"b{li}"], 0.0)
    mean = jnp.mean(h, axis=0, keepdims=True)
    var = jnp.maximum(jnp.mean(h * h, axis=0, keepdims=True) - mean * mean, 0.0)
    inv_std = jax.lax.rsqrt(var + BN_EPS)
    return (h - mean) * inv_std * params["gamma"] + params["beta"]


if __name__ == "__main__":
    key = jax.random.PRNGKey(0)
    key, kx, kp = jax.random.split(key, 3)

    in_feats, out_feats = 32, 64
    params = init_params(kp, in_feats, out_feats, layer_nums=3)

    # --- small single-tile batch ---
    x_small = jax.random.normal(kx, (8, in_feats), jnp.float32)
    out_small = jax.block_until_ready(dapp_mlp_forward(x_small, params))
    ref_small = reference_forward(x_small, params)
    assert out_small.shape == (8, out_feats)
    assert jnp.allclose(out_small, ref_small, atol=1e-4, rtol=1e-4), "small-batch mismatch"

    # --- ragged multi-tile batch: exercises tiling, padding mask, cross-tile BN stats ---
    key, kx2 = jax.random.split(key)
    x_big = jax.random.normal(kx2, (200, in_feats), jnp.float32)
    out_big = jax.block_until_ready(dapp_mlp_forward(x_big, params, tile_n=64))
    ref_big = reference_forward(x_big, params)
    assert out_big.shape == (200, out_feats)
    assert jnp.allclose(out_big, ref_big, atol=1e-4, rtol=1e-4), "tiled-batch mismatch"

    print("KERNEL_OK")
</pallas_src>

<mosaic_0001>
module attributes {stable_mosaic.version = 11 : i64} {
  func.func @dapp_mlp_kernel(%arg0: i32, %arg1: i32, %arg2: memref<8x32xf32, #tpu.memory_space<vmem>>, %arg3: memref<32x64xf32, #tpu.memory_space<vmem>>, %arg4: memref<1x64xf32, #tpu.memory_space<vmem>>, %arg5: memref<64x64xf32, #tpu.memory_space<vmem>>, %arg6: memref<1x64xf32, #tpu.memory_space<vmem>>, %arg7: memref<64x64xf32, #tpu.memory_space<vmem>>, %arg8: memref<1x64xf32, #tpu.memory_space<vmem>>, %arg9: memref<1x64xf32, #tpu.memory_space<vmem>>, %arg10: memref<1x64xf32, #tpu.memory_space<vmem>>, %arg11: memref<8x64xf32, #tpu.memory_space<vmem>>, %arg12: memref<1x64xf32, #tpu.memory_space<vmem>>, %arg13: memref<1x64xf32, #tpu.memory_space<vmem>>) attributes {dimension_semantics = [#tpu.dimension_semantics<arbitrary>, #tpu.dimension_semantics<arbitrary>], iteration_bounds = array<i64: 2, 1>, scalar_prefetch = 0 : i64, scratch_operands = 2 : i64, tpu.core_type = #tpu.core_type<tc>, window_params = [{transform_indices = @transform_0, window_bounds = array<i64: 8, 32>}, {pipeline_mode = #tpu.pipeline_mode<synchronous>, transform_indices = @transform_1, window_bounds = array<i64: 32, 64>}, {pipeline_mode = #tpu.pipeline_mode<synchronous>, transform_indices = @transform_2, window_bounds = array<i64: 1, 64>}, {pipeline_mode = #tpu.pipeline_mode<synchronous>, transform_indices = @transform_3, window_bounds = array<i64: 64, 64>}, {pipeline_mode = #tpu.pipeline_mode<synchronous>, transform_indices = @transform_4, window_bounds = array<i64: 1, 64>}, {pipeline_mode = #tpu.pipeline_mode<synchronous>, transform_indices = @transform_5, window_bounds = array<i64: 64, 64>}, {pipeline_mode = #tpu.pipeline_mode<synchronous>, transform_indices = @transform_6, window_bounds = array<i64: 1, 64>}, {pipeline_mode = #tpu.pipeline_mode<synchronous>, transform_indices = @transform_7, window_bounds = array<i64: 1, 64>}, {pipeline_mode = #tpu.pipeline_mode<synchronous>, transform_indices = @transform_8, window_bounds = array<i64: 1, 64>}, {transform_indices = @transform_9, window_bounds = array<i64: 8, 64>}]} {
    %c0 = arith.constant 0 : index
    %c0_0 = arith.constant 0 : index
    %0 = vector.load %arg2[%c0, %c0_0] : memref<8x32xf32, #tpu.memory_space<vmem>>, vector<8x32xf32>
    %1 = arith.truncf %0 : vector<8x32xf32> to vector<8x32xbf16>
    %c0_1 = arith.constant 0 : index
    %c0_2 = arith.constant 0 : index
    %2 = vector.load %arg3[%c0_1, %c0_2] : memref<32x64xf32, #tpu.memory_space<vmem>>, vector<32x64xf32>
    %3 = arith.truncf %2 : vector<32x64xf32> to vector<32x64xbf16>
    %cst = arith.constant dense<0.000000e+00> : vector<8x64xf32>
    %4 = tpu.matmul %1, %3, %cst {dimension_numbers = #tpu.dot_dimension_numbers<[1], [0], [0], [1], [0, 0, 1, 1], [], []>} : vector<8x32xbf16>, vector<32x64xbf16>, vector<8x64xf32> -> vector<8x64xf32>
    %c0_3 = arith.constant 0 : index
    %c0_4 = arith.constant 0 : index
    %5 = vector.load %arg4[%c0_3, %c0_4] : memref<1x64xf32, #tpu.memory_space<vmem>>, vector<1x64xf32>
    %6 = vector.broadcast %5 : vector<1x64xf32> to vector<8x64xf32>
    %7 = arith.addf %4, %6 : vector<8x64xf32>
    %cst_5 = arith.constant 0.000000e+00 : f32
    %8 = vector.broadcast %cst_5 : f32 to vector<8x64xf32>
    %9 = arith.maximumf %7, %8 : vector<8x64xf32>
    %10 = arith.truncf %9 : vector<8x64xf32> to vector<8x64xbf16>
    %c0_6 = arith.constant 0 : index
    %c0_7 = arith.constant 0 : index
    %11 = vector.load %arg5[%c0_6, %c0_7] : memref<64x64xf32, #tpu.memory_space<vmem>>, vector<64x64xf32>
    %12 = arith.truncf %11 : vector<64x64xf32> to vector<64x64xbf16>
    %cst_8 = arith.constant dense<0.000000e+00> : vector<8x64xf32>
    %13 = tpu.matmul %10, %12, %cst_8 {dimension_numbers = #tpu.dot_dimension_numbers<[1], [0], [0], [1], [0, 0, 1, 1], [], []>} : vector<8x64xbf16>, vector<64x64xbf16>, vector<8x64xf32> -> vector<8x64xf32>
    %c0_9 = arith.constant 0 : index
    %c0_10 = arith.constant 0 : index
    %14 = vector.load %arg6[%c0_9, %c0_10] : memref<1x64xf32, #tpu.memory_space<vmem>>, vector<1x64xf32>
    %15 = vector.broadcast %14 : vector<1x64xf32> to vector<8x64xf32>
    %16 = arith.addf %13, %15 : vector<8x64xf32>
    %cst_11 = arith.constant 0.000000e+00 : f32
    %17 = vector.broadcast %cst_11 : f32 to vector<8x64xf32>
    %18 = arith.maximumf %16, %17 : vector<8x64xf32>
    %19 = arith.truncf %18 : vector<8x64xf32> to vector<8x64xbf16>
    %c0_12 = arith.constant 0 : index
    %c0_13 = arith.constant 0 : index
    %20 = vector.load %arg7[%c0_12, %c0_13] : memref<64x64xf32, #tpu.memory_space<vmem>>, vector<64x64xf32>
    %21 = arith.truncf %20 : vector<64x64xf32> to vector<64x64xbf16>
    %cst_14 = arith.constant dense<0.000000e+00> : vector<8x64xf32>
    %22 = tpu.matmul %19, %21, %cst_14 {dimension_numbers = #tpu.dot_dimension_numbers<[1], [0], [0], [1], [0, 0, 1, 1], [], []>} : vector<8x64xbf16>, vector<64x64xbf16>, vector<8x64xf32> -> vector<8x64xf32>
    %c0_15 = arith.constant 0 : index
    %c0_16 = arith.constant 0 : index
    %23 = vector.load %arg8[%c0_15, %c0_16] : memref<1x64xf32, #tpu.memory_space<vmem>>, vector<1x64xf32>
    %24 = vector.broadcast %23 : vector<1x64xf32> to vector<8x64xf32>
    %25 = arith.addf %22, %24 : vector<8x64xf32>
    %cst_17 = arith.constant 0.000000e+00 : f32
    %26 = vector.broadcast %cst_17 : f32 to vector<8x64xf32>
    %27 = arith.maximumf %25, %26 : vector<8x64xf32>
    %c0_i32 = arith.constant 0 : i32
    %28 = arith.cmpi eq, %arg0, %c0_i32 : i32
    %c0_i32_18 = arith.constant 0 : i32
    %29 = arith.cmpi eq, %arg1, %c0_i32_18 : i32
    %30 = arith.andi %28, %29 : i1
    %31 = arith.extui %30 : i1 to i32
    %c0_i32_19 = arith.constant 0 : i32
    %32 = arith.cmpi ne, %31, %c0_i32_19 : i32
    scf.if %32 {
      %cst_26 = arith.constant 0.000000e+00 : f32
      %44 = vector.broadcast %cst_26 : f32 to vector<1x64xf32>
      %c0_27 = arith.constant 0 : index
      %c0_28 = arith.constant 0 : index
      %45 = vector.load %arg12[%c0_27, %c0_28] : memref<1x64xf32, #tpu.memory_space<vmem>>, vector<1x64xf32>
      tpu.vector_store %arg12[%c0_27, %c0_28], %44 {strides = array<i32>} : memref<1x64xf32, #tpu.memory_space<vmem>>, vector<1x64xf32>,
      %cst_29 = arith.constant 0.000000e+00 : f32
      %46 = vector.broadcast %cst_29 : f32 to vector<1x64xf32>
      %c0_30 = arith.constant 0 : index
      %c0_31 = arith.constant 0 : index
      %47 = vector.load %arg13[%c0_30, %c0_31] : memref<1x64xf32, #tpu.memory_space<vmem>>, vector<1x64xf32>
      tpu.vector_store %arg13[%c0_30, %c0_31], %46 {strides = array<i32>} : memref<1x64xf32, #tpu.memory_space<vmem>>, vector<1x64xf32>,
    } else {
    }
    %c0_i32_20 = arith.constant 0 : i32
    %33 = arith.cmpi eq, %arg0, %c0_i32_20 : i32
    %34 = arith.extui %33 : i1 to i32
    %c0_i32_21 = arith.constant 0 : i32
    %35 = arith.cmpi ne, %34, %c0_i32_21 : i32
    scf.if %35 {
      %c0_26 = arith.constant 0 : index
      %c0_27 = arith.constant 0 : index
      %44 = vector.load %arg12[%c0_26, %c0_27] : memref<1x64xf32, #tpu.memory_space<vmem>>, vector<1x64xf32>
      %cst_28 = arith.constant dense<0.000000e+00> : vector<64xf32>
      %45 = vector.multi_reduction <add>, %27, %cst_28 [0] : vector<8x64xf32> to vector<64xf32>
      %46 = vector.shape_cast %45 : vector<64xf32> to vector<1x64xf32>
      %47 = arith.addf %44, %46 : vector<1x64xf32>
      %c0_29 = arith.constant 0 : index
      %c0_30 = arith.constant 0 : index
      %48 = vector.load %arg12[%c0_29, %c0_30] : memref<1x64xf32, #tpu.memory_space<vmem>>, vector<1x64xf32>
      tpu.vector_store %arg12[%c0_29, %c0_30], %47 {strides = array<i32>} : memref<1x64xf32, #tpu.memory_space<vmem>>, vector<1x64xf32>,
      %c0_31 = arith.constant 0 : index
      %c0_32 = arith.constant 0 : index
      %49 = vector.load %arg13[%c0_31, %c0_32] : memref<1x64xf32, #tpu.memory_space<vmem>>, vector<1x64xf32>
      %50 = arith.mulf %27, %27 : vector<8x64xf32>
      %cst_33 = arith.constant dense<0.000000e+00> : vector<64xf32>
      %51 = vector.multi_reduction <add>, %50, %cst_33 [0] : vector<8x64xf32> to vector<64xf32>
      %52 = vector.shape_cast %51 : vector<64xf32> to vector<1x64xf32>
      %53 = arith.addf %49, %52 : vector<1x64xf32>
      %c0_34 = arith.constant 0 : index
      %c0_35 = arith.constant 0 : index
      %54 = vector.load %arg13[%c0_34, %c0_35] : memref<1x64xf32, #tpu.memory_space<vmem>>, vector<1x64xf32>
      tpu.vector_store %arg13[%c0_34, %c0_35], %53 {strides = array<i32>} : memref<1x64xf32, #tpu.memory_space<vmem>>, vector<1x64xf32>,
    } else {
    }
    %c1_i32 = arith.constant 1 : i32
    %36 = arith.cmpi eq, %arg0, %c1_i32 : i32
    %c0_i32_22 = arith.constant 0 : i32
    %37 = arith.cmpi eq, %arg1, %c0_i32_22 : i32
    %38 = arith.andi %36, %37 : i1
    %39 = arith.extui %38 : i1 to i32
    %c0_i32_23 = arith.constant 0 : i32
    %40 = arith.cmpi ne, %39, %c0_i32_23 : i32
    scf.if %40 {
      %c0_26 = arith.constant 0 : index
      %c0_27 = arith.constant 0 : index
      %44 = vector.load %arg12[%c0_26, %c0_27] : memref<1x64xf32, #tpu.memory_space<vmem>>, vector<1x64xf32>
      %cst_28 = arith.constant 1.250000e-01 : f32
      %45 = vector.broadcast %cst_28 : f32 to vector<1x64xf32>
      %46 = arith.mulf %44, %45 : vector<1x64xf32>
      %c0_29 = arith.constant 0 : index
      %c0_30 = arith.constant 0 : index
      %47 = vector.load %arg13[%c0_29, %c0_30] : memref<1x64xf32, #tpu.memory_space<vmem>>, vector<1x64xf32>
      %cst_31 = arith.constant 1.250000e-01 : f32
      %48 = vector.broadcast %cst_31 : f32 to vector<1x64xf32>
      %49 = arith.mulf %47, %48 : vector<1x64xf32>
      %50 = arith.mulf %46, %46 : vector<1x64xf32>
      %51 = arith.subf %49, %50 : vector<1x64xf32>
      %cst_32 = arith.constant 0.000000e+00 : f32
      %52 = vector.broadcast %cst_32 : f32 to vector<1x64xf32>
      %53 = arith.maximumf %51, %52 : vector<1x64xf32>
      %cst_33 = arith.constant 9.99999974E-6 : f32
      %54 = vector.broadcast %cst_33 : f32 to vector<1x64xf32>
      %55 = arith.addf %53, %54 : vector<1x64xf32>
      %56 = math.rsqrt %55 : vector<1x64xf32>
      %c0_34 = arith.constant 0 : index
      %c0_35 = arith.constant 0 : index
      %57 = vector.load %arg9[%c0_34, %c0_35] : memref<1x64xf32, #tpu.memory_space<vmem>>, vector<1x64xf32>
      %58 = arith.mulf %57, %56 : vector<1x64xf32>
      %c0_36 = arith.constant 0 : index
      %c0_37 = arith.constant 0 : index
      %59 = vector.load %arg12[%c0_36, %c0_37] : memref<1x64xf32, #tpu.memory_space<vmem>>, vector<1x64xf32>
      tpu.vector_store %arg12[%c0_36, %c0_37], %58 {strides = array<i32>} : memref<1x64xf32, #tpu.memory_space<vmem>>, vector<1x64xf32>,
      %c0_38 = arith.constant 0 : index
      %c0_39 = arith.constant 0 : index
      %60 = vector.load %arg10[%c0_38, %c0_39] : memref<1x64xf32, #tpu.memory_space<vmem>>, vector<1x64xf32>
      %61 = arith.mulf %46, %58 : vector<1x64xf32>
      %62 = arith.subf %60, %61 : vector<1x64xf32>
      %c0_40 = arith.constant 0 : index
      %c0_41 = arith.constant 0 : index
      %63 = vector.load %arg13[%c0_40, %c0_41] : memref<1x64xf32, #tpu.memory_space<vmem>>, vector<1x64xf32>
      tpu.vector_store %arg13[%c0_40, %c0_41], %62 {strides = array<i32>} : memref<1x64xf32, #tpu.memory_space<vmem>>, vector<1x64xf32>,
    } else {
    }
    %c1_i32_24 = arith.constant 1 : i32
    %41 = arith.cmpi eq, %arg0, %c1_i32_24 : i32
    %42 = arith.extui %41 : i1 to i32
    %c0_i32_25 = arith.constant 0 : i32
    %43 = arith.cmpi ne, %42, %c0_i32_25 : i32
    scf.if %43 {
      %c0_26 = arith.constant 0 : index
      %c0_27 = arith.constant 0 : index
      %44 = vector.load %arg12[%c0_26, %c0_27] : memref<1x64xf32, #tpu.memory_space<vmem>>, vector<1x64xf32>
      %45 = vector.broadcast %44 : vector<1x64xf32> to vector<8x64xf32>
      %46 = arith.mulf %27, %45 : vector<8x64xf32>
      %c0_28 = arith.constant 0 : index
      %c0_29 = arith.constant 0 : index
      %47 = vector.load %arg13[%c0_28, %c0_29] : memref<1x64xf32, #tpu.memory_space<vmem>>, vector<1x64xf32>
      %48 = vector.broadcast %47 : vector<1x64xf32> to vector<8x64xf32>
      %49 = arith.addf %46, %48 : vector<8x64xf32>
      %c0_30 = arith.constant 0 : index
      %c0_31 = arith.constant 0 : index
      %50 = vector.load %arg11[%c0_30, %c0_31] : memref<8x64xf32, #tpu.memory_space<vmem>>, vector<8x64xf32>
      tpu.vector_store %arg11[%c0_30, %c0_31], %49 {strides = array<i32>} : memref<8x64xf32, #tpu.memory_space<vmem>>, vector<8x64xf32>,
    } else {
    }
    return
  }
  func.func @transform_0(%arg0: i32, %arg1: i32) -> (i32, i32) {
    %c0_i32 = arith.constant 0 : i32
    %c0_i32_0 = arith.constant 0 : i32
    return %arg1, %c0_i32 : i32, i32
  }
  func.func @transform_1(%arg0: i32, %arg1: i32) -> (i32, i32) {
    %c0_i32 = arith.constant 0 : i32
    %c0_i32_0 = arith.constant 0 : i32
    %c0_i32_1 = arith.constant 0 : i32
    return %c0_i32, %c0_i32_0 : i32, i32
  }
  func.func @transform_2(%arg0: i32, %arg1: i32) -> (i32, i32) {
    %c0_i32 = arith.constant 0 : i32
    %c0_i32_0 = arith.constant 0 : i32
    %c0_i32_1 = arith.constant 0 : i32
    return %c0_i32, %c0_i32_0 : i32, i32
  }
  func.func @transform_3(%arg0: i32, %arg1: i32) -> (i32, i32) {
    %c0_i32 = arith.constant 0 : i32
    %c0_i32_0 = arith.constant 0 : i32
    %c0_i32_1 = arith.constant 0 : i32
    return %c0_i32, %c0_i32_0 : i32, i32
  }
  func.func @transform_4(%arg0: i32, %arg1: i32) -> (i32, i32) {
    %c0_i32 = arith.constant 0 : i32
    %c0_i32_0 = arith.constant 0 : i32
    %c0_i32_1 = arith.constant 0 : i32
    return %c0_i32, %c0_i32_0 : i32, i32
  }
  func.func @transform_5(%arg0: i32, %arg1: i32) -> (i32, i32) {
    %c0_i32 = arith.constant 0 : i32
    %c0_i32_0 = arith.constant 0 : i32
    %c0_i32_1 = arith.constant 0 : i32
    return %c0_i32, %c0_i32_0 : i32, i32
  }
  func.func @transform_6(%arg0: i32, %arg1: i32) -> (i32, i32) {
    %c0_i32 = arith.constant 0 : i32
    %c0_i32_0 = arith.constant 0 : i32
    %c0_i32_1 = arith.constant 0 : i32
    return %c0_i32, %c0_i32_0 : i32, i32
  }
  func.func @transform_7(%arg0: i32, %arg1: i32) -> (i32, i32) {
    %c0_i32 = arith.constant 0 : i32
    %c0_i32_0 = arith.constant 0 : i32
    %c0_i32_1 = arith.constant 0 : i32
    return %c0_i32, %c0_i32_0 : i32, i32
  }
  func.func @transform_8(%arg0: i32, %arg1: i32) -> (i32, i32) {
    %c0_i32 = arith.constant 0 : i32
    %c0_i32_0 = arith.constant 0 : i32
    %c0_i32_1 = arith.constant 0 : i32
    return %c0_i32, %c0_i32_0 : i32, i32
  }
  func.func @transform_9(%arg0: i32, %arg1: i32) -> (i32, i32) {
    %0 = arith.muli %arg1, %arg0 : i32
    %c0_i32 = arith.constant 0 : i32
    %c0_i32_0 = arith.constant 0 : i32
    return %0, %c0_i32 : i32, i32
  }
}

</mosaic_0001>

<bundles_post_ra>
// kernel: tpu_custom_call.1
= control target key start
LH: loop header
LB: loop body
LE: loop exit
PB: predicated region body
PF: predicated region fallthrough
CT: control target
= control target key end

     0   :  { %14 = vsyncpa [#allocation5], 0  ;;  %s1324_s0 = inlined_call_operand.hbm [shape: f32[8,32], index: 0, kind: input, shape index: {}]   ;;  %s1325_s1 = inlined_call_operand.hbm [shape: f32[32,64], index: 1, kind: input, shape index: {}]   ;;  %s1326_s2 = inlined_call_operand.vmem [shape: f32[1,64], index: 2, kind: input, shape index: {}]   ;;  %s1327_s3 = inlined_call_operand.hbm [shape: f32[64,64], index: 3, kind: input, shape index: {}]   ;;  %s1328_s4 = inlined_call_operand.vmem [shape: f32[1,64], index: 4, kind: input, shape index: {}]   ;;  %s1329_s5 = inlined_call_operand.hbm [shape: f32[64,64], index: 5, kind: input, shape index: {}]   ;;  %s1330_s6 = inlined_call_operand.vmem [shape: f32[1,64], index: 6, kind: input, shape index: {}]   ;;  %s1331_s7 = inlined_call_operand.vmem [shape: f32[1,64], index: 7, kind: input, shape index: {}]   ;;  %s1332_s8 = inlined_call_operand.vmem [shape: f32[1,64], index: 8, kind: input, shape index: {}]   ;;  %s1333_s9 = inlined_call_operand.hbm [shape: f32[8,64], index: 9, kind: output, shape index: {}]  }
   0x1   :  { %15 = vsyncpa [#allocation8], 0 }
   0x2   :  { %16 = vsyncpa [#allocation11], 0 }
   0x3   :  { %17 = vsyncpa [#allocation6], 0 }
   0x4   :  { %19 = vsyncpa [#allocation6 + $0x1], 0  ;;  %s1156_s30 = smov 0   ;;  %s1158_s10 = smov 0  }
   0x5   :  { %s1160_s11 = smov 0  }
   0x6 LB: > { %s1096_s12 = smov [#allocation7]   ;;  %s769_s14 = sadd.s32 4294967295, %s1094_s11   ;;  %s1094_s11 = sphi %s1160_s11, %s25_s11   ;;  %s1090_s10 = sphi %s1158_s10, %s1343_s10   ;;  %s1086_s30 = sphi %s1156_s30, %s1342_s30  }
   0x7   : > { %s289_s13 = sshll.u32 %s1096_s12, 4  ;;  %s770_s15 = sadd.s32 4294967294, %s1094_s11   ;;  %s290_s13 = int_to_ptr.vmem [resolvable:$true] %s289_s13 }
   0x8   : > { %p771_p0 = scmp.ge.s32.totalorder %s1094_s11, 1  ;;  %p264_p1 = scmp.lt.s32.totalorder %s1094_s11, 3 }
   0x9   : > { %p1177_p2 = scmp.eq.s32.totalorder %s769_s14, 0  ;;  %s37_s19 = sadd.s32 1, %s1090_s10 }
   0xa   : > { %p1181_p3 = pnand %p771_p0, %p264_p1  ;;  %p1194_p6 = scmp.ge.s32.totalorder %s37_s19, 2 }
   0xb   : > { %s1336_s16 = scalar_select %p1177_p2, 1, 0 }
   0xc   : > { %p864_p4 = pneg %p1181_p3  ;;  %s939_s21 = scalar_lea.vmem %s290_s13, 512 }
   0xd   : > { %p940_p8 = scmp.ne.s32.totalorder %s290_s13, %s939_s21  ;;  %p947_p11 = scmp.lt.s32.totalorder %s290_s13, %s290_s13 }
   0xe   : > { %p1189_p5 = pnand %p1177_p2, %p864_p4  ;;  %p948_p12 = scmp.lt.s32.totalorder %s939_s21, %s939_s21 }
  0x10   : > { %p930_p7 = pneg %p1189_p5  ;;  %p949_p13 = por %p948_p12, %p947_p11 }
  0x12   : > { %p942_p9 = pnand %p940_p8, %p930_p7 }
  0x14   : > { %p943_p10 = pneg %p942_p9 }
  0x16   : > { %p950_p0 = pnand %p949_p13, %p943_p10 }
  0x18   : > { %953 = shalt.err (!%p950_p0)
}
  0x19   : > { %s1097_s22 = smov 128   ;;  %s1098_s23 = smov 8  }
  0x1a   : > { %870 = dma.hbm_to_vmem [thread:$0]  (!%p1189_p5), %s1325_s1, 512, %s290_s13, [#allocation8], %s1097_s22, %s1097_s22, %s1098_s23  }
  0x1b   : > { %s1345_s19 = smov (%p1194_p6, %s37_s19), 0  ;;  %s1099_s26 = smov [#allocation4]  }
  0x1c   : > { %s279_s27 = sshll.u32 %s1099_s26, 4  ;;  %s1100_s28 = smov [#allocation9]   ;;  %s280_s27 = int_to_ptr.vmem [resolvable:$true] %s279_s27 }
  0x1d   : > { %s305_s29 = sshll.u32 %s1100_s28, 4  ;;  %s965_s12 = scalar_lea.vmem %s280_s27, 128  ;;  %s306_s29 = int_to_ptr.vmem [resolvable:$true] %s305_s29 }
  0x1e   : > { %p966_p1 = scmp.ne.s32.totalorder %s280_s27, %s965_s12  ;;  %p973_p9 = scmp.lt.s32.totalorder %s280_s27, %s280_s27 }
  0x1f   : > { %p974_p10 = scmp.lt.s32.totalorder %s965_s12, %s965_s12 }
  0x20   : > { %p968_p4 = pnand %p966_p1, %p930_p7 }
  0x21   : > { %p975_p11 = por %p974_p10, %p973_p9 }
  0x22   : > { %p969_p8 = pneg %p968_p4 }
  0x24   : > { %p976_p12 = pnand %p975_p11, %p969_p8 }
  0x26   : > { %979 = shalt.err (!%p976_p12)
}
  0x27   : > { %867 = dma.hbm_to_vmem [thread:$0]  (!%p1189_p5), %s1324_s0, 128, %s280_s27, [#allocation5]  }
  0x28   : > { %s991_s21 = scalar_lea.vmem %s306_s29, 1024  ;;  %p999_p1 = scmp.lt.s32.totalorder %s306_s29, %s306_s29 }
  0x29   : > { %p992_p6 = scmp.ne.s32.totalorder %s306_s29, %s991_s21  ;;  %p1000_p4 = scmp.lt.s32.totalorder %s991_s21, %s991_s21 }
  0x2b   : > { %p994_p13 = pnand %p992_p6, %p930_p7  ;;  %p1001_p2 = por %p1000_p4, %p999_p1 }
  0x2d   : > { %p995_p0 = pneg %p994_p13 }
  0x2f   : > { %p1002_p9 = pnand %p1001_p2, %p995_p0 }
  0x31   : > { %1005 = shalt.err (!%p1002_p9)
}
  0x32   : > { %873 = dma.hbm_to_vmem [thread:$0]  (!%p1189_p5), %s1327_s3, 1024, %s306_s29, [#allocation8], %s1097_s22, %s1097_s22, %s1098_s23  }
  0x33   : > { %s1101_s26 = smov [#allocation10]  }
  0x34   : > { %s321_s27 = sshll.u32 %s1101_s26, 4  ;;  %s322_s27 = int_to_ptr.vmem [resolvable:$true] %s321_s27 }
  0x35   : > { %s1017_s28 = scalar_lea.vmem %s322_s27, 1024  ;;  %p1025_p11 = scmp.lt.s32.totalorder %s322_s27, %s322_s27 }
  0x36   : > { %p1018_p8 = scmp.ne.s32.totalorder %s322_s27, %s1017_s28  ;;  %p1026_p12 = scmp.lt.s32.totalorder %s1017_s28, %s1017_s28 }
  0x38   : > { %p1020_p10 = pnand %p1018_p8, %p930_p7  ;;  %p1027_p6 = por %p1026_p12, %p1025_p11 }
  0x3a   : > { %p1021_p2 = pneg %p1020_p10 }
  0x3c   : > { %p1028_p13 = pnand %p1027_p6, %p1021_p2 }
  0x3e   : > { %1031 = shalt.err (!%p1028_p13)
}
  0x3f   : > { %876 = dma.hbm_to_vmem [thread:$0]  (!%p1189_p5), %s1329_s5, 1024, %s322_s27, [#allocation11], %s1097_s22, %s1097_s22, %s1098_s23  }
  0x40   : > { %346 = sbr.rel (%p1181_p3) target bundleno = 768 (0x300), region = 56  ;;  %p1340_p7 = scmp.ne.s32.totalorder (!%p1181_p3), %s1336_s16, 0 }
  0x45   : > { %1069 = dma.done.wait (%p1340_p7), [#allocation5], 128  }
  0x46   : > { %1071 = vsyncadd (%p1340_p7), [#allocation5], 4294967168 }
  0x47   : > { %1073 = dma.done.wait (%p1340_p7), [#allocation8], 1536  }
  0x48   : > { %1075 = vsyncadd (%p1340_p7), [#allocation8], 4294965760 }
  0x49   : > { %1077 = dma.done.wait (%p1340_p7), [#allocation11], 1024  }
  0x4a   : > { %1079 = vsyncadd (%p1340_p7), [#allocation11], 4294966272  ;;  %v1102_v0 = vmov 0.0   ;;  %vm1103_vm0 = vmmov 0   ;;  %v395_v1 = vld [vmem:[#allocation7 + $0x10] sm:$0xff]  ;;  %v396_v2 = vld [vmem:[#allocation7 + $0x18] sm:$0xff] }
  0x4b   : > { %812 = vmatprep.subr.bf16.mxu0 %v1102_v0  ;;  %816 = vmatprep.mubr.msk.bf16.mxu0 %vm1103_vm0, %v1102_v0  ;;  %v393_v3 = vld [vmem:[#allocation7] sm:$0xff]  ;;  %v398_v4 = vpack.c.bf16 %v396_v2, %v395_v1  ;;  %v394_v5 = vld [vmem:[#allocation7 + $0x8] sm:$0xff]  ;;  %v458_v6 = vld [vmem:[#allocation9 + $0x30] sm:$0xff]  ;;  %vm406_vm1 = vcmask 261120   ;;  %vm471_vm2 = vcmask 523264   ;;  %p580_p3 = scmp.eq.s32.totalorder %s1086_s30, 0 }
  0x4c   : > { %820 = vmatprep.subr.bf16.mxu1 %v1102_v0  ;;  %828 = vmatprep.mubr.msk.bf16.mxu1 %vm1103_vm0, %v1102_v0  ;;  %v459_v7 = vld [vmem:[#allocation9 + $0x38] sm:$0xff]  ;;  %v456_v8 = vld [vmem:[#allocation9 + $0x20] sm:$0xff]  ;;  %v457_v9 = vld [vmem:[#allocation9 + $0x28] sm:$0xff]  ;;  %v397_v10 = vpack.c.bf16 %v394_v5, %v393_v3  ;;  %vm586_vm3 = vcmask (%p580_p3), 516096   ;;  %v1104_v56 = vmov (%p580_p3), 0.0  }
  0x4d   : > { %813 = vmatpush3.bf16.msra.mxu0 %v398_v4  ;;  %v391_v11 = vld [vmem:[#allocation4] sm:$0xff]  ;;  %v463_v12 = vpack.c.bf16 %v459_v7, %v458_v6  ;;  %v462_v13 = vpack.c.bf16 %v457_v9, %v456_v8  ;;  %v454_v15 = vld [vmem:[#allocation9 + $0x10] sm:$0xff]  ;;  %v452_v18 = vld [vmem:[#allocation9] sm:$0xff]  ;;  %587 = vst.msk [vmem:[#allocation2] sm:$0x1] (%p580_p3), %vm586_vm3, %v1104_v56 }
  0x4e   : > { %814 = vmatprep.subr.bf16.mxu0 %v1102_v0  ;;  %v392_v14 = vpack.c.bf16 %v391_v11, %v391_v11  ;;  %v455_v16 = vld [vmem:[#allocation9 + $0x18] sm:$0xff]  ;;  %v453_v19 = vld [vmem:[#allocation9 + $0x8] sm:$0xff]  ;;  %v523_v21 = vld [vmem:[#allocation10 + $0x30] sm:$0xff]  ;;  %588 = vst.msk [vmem:[#allocation3] sm:$0x1] (%p580_p3), %vm586_vm3, %v1104_v56 }
  0x4f   : > { %821 = vmatpush3.bf16.msra.mxu1 %v463_v12  ;;  %v461_v17 = vpack.c.bf16 %v455_v16, %v454_v15  ;;  %v460_v20 = vpack.c.bf16 %v453_v19, %v452_v18  ;;  %v524_v22 = vld [vmem:[#allocation10 + $0x38] sm:$0xff]  ;;  %v521_v23 = vld [vmem:[#allocation10 + $0x20] sm:$0xff]  ;;  %v522_v25 = vld [vmem:[#allocation10 + $0x28] sm:$0xff] }
  0x50   : > { %822 = vmatprep.subr.bf16.mxu1 %v1102_v0  ;;  %v528_v24 = vpack.c.bf16 %v524_v22, %v523_v21  ;;  %v527_v26 = vpack.c.bf16 %v522_v25, %v521_v23  ;;  %v781_v27 = vld [vmem:[%s1326_s2] ss:$0 sm:$0xff]  ;;  %v520_v36 = vld [vmem:[#allocation10 + $0x18] sm:$0xff]  ;;  %v517_v38 = vld [vmem:[#allocation10] sm:$0xff] }
  0x51   : > { %815 = vmatpush3.bf16.msra.mxu0 %v397_v10  ;;  %v519_v35 = vld [vmem:[#allocation10 + $0x10] sm:$0xff]  ;;  %v518_v39 = vld [vmem:[#allocation10 + $0x8] sm:$0xff] }
  0x52   : > { %832 = vmatprep.subr.bf16.mxu0 %v1102_v0  ;;  %v526_v37 = vpack.c.bf16 %v520_v36, %v519_v35  ;;  %v525_v40 = vpack.c.bf16 %v518_v39, %v517_v38  ;;  %v783_v41 = vld [vmem:[%s1328_s4] ss:$0 sm:$0xff] }
  0x53   : > { %823 = vmatpush3.bf16.msra.mxu1 %v462_v13  ;;  %v785_v49 = vld [vmem:[%s1330_s6] ss:$0 sm:$0xff] }
  0x54   : > { %817 = vmatmul.mubr.msk.bf16.vlgmr.msra.gmra.mxu0 %vm406_vm1, %v392_v14  ;;  %824 = vmatprep.subr.bf16.mxu1 %v1102_v0 }
  0x55   : > { %840 = vmatprep.mubr.msk.bf16.mxu0 %vm1103_vm0, %v1102_v0  ;;  %833 = vmatpush3.bf16.msra.mxu0 %v528_v24 }
  0x56   : > { %834 = vmatprep.subr.bf16.mxu0 %v1102_v0 }
  0x57   : > { %825 = vmatpush3.bf16.msra.mxu1 %v461_v17 }
  0x58   : > { %826 = vmatprep.subr.bf16.mxu1 %v1102_v0 }
  0x59   : > { %835 = vmatpush3.bf16.msra.mxu0 %v527_v26 }
  0x5a   : > { %836 = vmatprep.subr.bf16.mxu0 %v1102_v0 }
  0x5b   : > { %827 = vmatpush3.bf16.msra.mxu1 %v460_v20 }
  0x5d   : > { %837 = vmatpush3.bf16.msra.mxu0 %v526_v37 }
  0x5e   : > { %838 = vmatprep.subr.bf16.mxu0 %v1102_v0 }
  0x61   : > { %839 = vmatpush3.bf16.msra.mxu0 %v525_v40 }
 0x114   : > { %v444_v28 = vpop.f32.mrf.mxu0 }
 0x115   : > { %v445_v29 = vadd.f32 %v781_v27, %v444_v28 }
 0x116   : > { %v818_v30 = vpop.f32.mrf.mxu0 }
 0x117   : > { %v450_v31 = vmax.f32 %v445_v29, 0.0 }
 0x118   : > { %v447_v32 = vpop.f32.mrf.mxu0 }
 0x119   : > { %v451_v33 = vpack.c.bf16 %v450_v31, %v450_v31 }
 0x11a   : > { %v819_v34 = vpop.f32.mrf.mxu0 }
 0x11b   : > { %829 = vmatmul.mubr.msk.bf16.vlgmr.msra.gmra.mxu1 %vm471_vm2, %v451_v33 }
 0x1db   : > { %v509_v42 = vpop.f32.mrf.mxu1 }
 0x1dc   : > { %v510_v43 = vadd.f32 %v783_v41, %v509_v42 }
 0x1dd   : > { %v830_v44 = vpop.f32.mrf.mxu1 }
 0x1de   : > { %v515_v45 = vmax.f32 %v510_v43, 0.0 }
 0x1df   : > { %v512_v46 = vpop.f32.mrf.mxu1 }
 0x1e0   : > { %v516_v47 = vpack.c.bf16 %v515_v45, %v515_v45 }
 0x1e1   : > { %v831_v48 = vpop.f32.mrf.mxu1 }
 0x1e2   : > { %841 = vmatmul.mubr.msk.bf16.vlgmr.msra.gmra.mxu0 %vm471_vm2, %v516_v47 }
 0x2a2   : > { %v573_v50 = vpop.f32.mrf.mxu0 }
 0x2a3   : > { %v574_v51 = vadd.f32 %v785_v49, %v573_v50 }
 0x2a4   : > { %v842_v52 = vpop.f32.mrf.mxu0  ;;  %585 = sbr.rel (!%p580_p3) target bundleno = 681 (0x2a9), region = 76 }
 0x2a5   : > { %v579_v53 = vmax.f32 %v574_v51, 0.0 }
 0x2a6   : > { %v576_v54 = vpop.f32.mrf.mxu0 }
 0x2a8   : > { %v843_v55 = vpop.f32.mrf.mxu0 }
 0x2a9 PF: > { %p788_p5 = scmp.ne.s32.totalorder %s1086_s30, 0 }
 0x2ab   : > { %591 = sbr.rel (%p788_p5) target bundleno = 706 (0x2c2), region = 80 }
 0x2b0   : > { %v593_v57 = vsel %vm471_vm2, %v579_v53, 0.0  ;;  %v604_v58 = vmul.f32 %v579_v53, %v579_v53  ;;  %v592_v5 = vld [vmem:[#allocation2] sm:$0x1]  ;;  %vm601_vm4 = vcmask 516096   ;;  %v603_v8 = vld [vmem:[#allocation3] sm:$0x1] }
 0x2b1   : > { %v594_v59 = vrot.slane %v593_v57, 4 }
 0x2b2   : > { %v605_v60 = vsel %vm471_vm2, %v604_v58, 0.0 }
 0x2b3   : > { %v595_v61 = vadd.f32 %v594_v59, %v593_v57  ;;  %v606_v62 = vrot.slane %v605_v60, 4 }
 0x2b5   : > { %v596_v63 = vrot.slane %v595_v61, 2  ;;  %v607_v0 = vadd.f32 %v606_v62, %v605_v60 }
 0x2b7   : > { %v597_v1 = vadd.f32 %v596_v63, %v595_v61  ;;  %v608_v2 = vrot.slane %v607_v0, 2 }
 0x2b9   : > { %v598_v3 = vrot.slane %v597_v1, 1  ;;  %v609_v4 = vadd.f32 %v608_v2, %v607_v0 }
 0x2bb   : > { %v599_v6 = vadd.f32 %v598_v3, %v597_v1  ;;  %v610_v7 = vrot.slane %v609_v4, 1 }
 0x2bd   : > { %v600_v9 = vadd.f32 %v599_v6, %v592_v5  ;;  %v611_v10 = vadd.f32 %v610_v7, %v609_v4 }
 0x2bf   : > { %602 = vst.msk [vmem:[#allocation2] sm:$0x1] %vm601_vm4, %v600_v9  ;;  %v612_v11 = vadd.f32 %v611_v10, %v603_v8 }
 0x2c1   : > { %613 = vst.msk [vmem:[#allocation3] sm:$0x1] %vm601_vm4, %v612_v11 }
 0x2c2 PF: > { %p614_p0 = scmp.eq.s32.totalorder %s1086_s30, 1 }
 0x2c3   : > { %v628_v20 = vld [vmem:[%s1331_s7] sm:$0x1] (%p614_p0)  ;;  %vm630_vm5 = vcmask (%p614_p0), 516096  }
 0x2c4   : > { %618 = sbr.rel (!%p614_p0) target bundleno = 742 (0x2e6), region = 84  ;;  %v632_v23 = vld [vmem:[%s1332_s8] sm:$0x1] (%p614_p0) }
 0x2c6   : > { %v619_v12 = vld [vmem:[#allocation2] sm:$0x1] (%p614_p0) }
 0x2c7   : > { %v620_v14 = vmul.f32 (%p614_p0), 0.125, %v619_v12 }
 0x2c8   : > { %v621_v13 = vld [vmem:[#allocation3] sm:$0x1] (%p614_p0) }
 0x2c9   : > { %v622_v15 = vmul.f32 0.125, %v621_v13  ;;  %v623_v16 = vmul.f32 %v620_v14, %v620_v14 }
 0x2cb   : > { %v624_v17 = vsub.f32 %v622_v15, %v623_v16 }
 0x2cd   : > { %v625_v18 = vmax.f32 %v624_v17, 0.0 }
 0x2cf   : > { %v626_v19 = vadd.f32 1e-05, %v625_v18 }
 0x2d1   : > { %926 = vrsqrt.f32 %v626_v19 }
 0x2de   : > { %v927_v21 = vpop.eup %926 }
 0x2df   : > { %v629_v22 = vmul.f32 %v927_v21, %v628_v20 }
 0x2e1   : > { %631 = vst.msk [vmem:[#allocation2] sm:$0x1] %vm630_vm5, %v629_v22  ;;  %v633_v24 = vmul.f32 %v629_v22, %v620_v14 }
 0x2e3   : > { %v634_v25 = vsub.f32 %v632_v23, %v633_v24 }
 0x2e5   : > { %635 = vst.msk [vmem:[#allocation3] sm:$0x1] %vm630_vm5, %v634_v25 }
 0x2e6 PF: > { %p790_p1 = scmp.ne.s32.totalorder %s1086_s30, 1 }
 0x2e8   : > { %638 = sbr.rel (%p790_p1) target bundleno = 755 (0x2f3), region = 88 }
 0x2ed   : > { %v791_v26 = vld [vmem:[#allocation2] ss:$0 sm:$0xff]  ;;  %v792_v27 = vld [vmem:[#allocation3] ss:$0 sm:$0xff] }
 0x2ee   : > { %v646_v28 = vmul.f32 %v791_v26, %v579_v53 }
 0x2f0   : > { %v654_v29 = vadd.f32 %v792_v27, %v646_v28 }
 0x2f2   : > { %655 = vst.msk [vmem:[#allocation12] sm:$0xff] %vm471_vm2, %v654_v29 }
 0x2f3 PF: > { %p1301_p4 = scmp.eq.s32.totalorder %s769_s14, 1  ;;  %s1105_s27 = smov [#allocation12]  }
 0x2f4   : > { %s671_s28 = sshll.u32 %s1105_s27, 4  ;;  %s672_s28 = int_to_ptr.vmem [resolvable:$true] %s671_s28 }
 0x2f5   : > { %s1032_s29 = scalar_lea.vmem %s672_s28, 128  ;;  %s1038_s30 = scalar_lea.vmem %s672_s28, 256 }
 0x2f6   : > { %p1033_p9 = scmp.ne.s32.totalorder %s672_s28, %s1032_s29  ;;  %p1039_p2 = scmp.lt.s32.totalorder %s672_s28, %s672_s28 }
 0x2f7   : > { %p1040_p11 = scmp.lt.s32.totalorder %s1038_s30, %s1032_s29 }
 0x2f8   : > { %p1034_p8 = pnand %p1033_p9, %p1301_p4 }
 0x2f9   : > { %p1041_p12 = por %p1040_p11, %p1039_p2 }
 0x2fa   : > { %p1035_p10 = pneg %p1034_p8 }
 0x2fc   : > { %p1042_p6 = pnand %p1041_p12, %p1035_p10 }
 0x2fe   : > { %1045 = shalt.err (!%p1042_p6)
}
 0x2ff   : > { %861 = dma.vmem_to_hbm [thread:$0]  (%p1301_p4), %s672_s28, 128, %s1333_s9, [#allocation6]  }
 0x300 PF: > { %p890_p13 = scmp.ge.s32.totalorder %s1094_s11, 2  ;;  %p891_p7 = scmp.eq.s32.totalorder %s770_s15, 1 }
 0x302   : > { %p878_p3 = pnand %p891_p7, %p890_p13 }
 0x304   : > { %p879_p5 = pneg %p878_p3 }
 0x306   : > { %1081 = dma.done.wait (%p879_p5), [#allocation6], 128  }
 0x307   : > { %1083 = vsyncadd (%p879_p5), [#allocation6], 4294967168  ;;  %s25_s11 = sadd.s32 1, %s1094_s11   ;;  %s1342_s30 = smov %s1090_s10 }
 0x308   : > { %p22_p0 = scmp.ge.s32.totalorder %s25_s11, 4   ;;  %s1343_s10 = smov %s1345_s19 }
 0x30a   :  { %24 = sbr.rel (!%p22_p0) target bundleno = 6 (0x6), region = 122 }
 0x30f   :  { %689 = vsyncpa [#allocation5], 1 }
 0x310   :  { %691 = vsyncpa [#allocation5 + $0x1], 1 }
 0x311   :  { %692 = vsyncpa [#allocation8], 1 }
 0x312   :  { %693 = vsyncpa [#allocation11], 1 }
 0x313   :  { %694 = vsyncpa [#allocation6], 1 }
 0x314   :  { %696 = vsyncpa [#allocation6 + $0x1], 1 }

</bundles_post_ra>
